<compile_context>
chip_gen: v5e
topology: v5e:2x2
jax: 0.10.0
libtpu: 0.0.40
codegen_flags: <defaults>
</compile_context>

<pallas_src>
import functools
import numpy as np
import jax
import jax.numpy as jnp
from jax.experimental import pallas as pl
from jax.experimental.pallas import tpu as pltpu


# canonical 3x3 offset order (dy, dx); shift(x, dy, dx)[p] = x[p - dy*W - dx]
_OFFSETS_3x3 = tuple((dy, dx) for dy in (-1, 0, 1) for dx in (-1, 0, 1))

# 4x4 / stride-2 / pad-1 ConvTranspose phase taps: phase -> ((kernel_idx, shift),...)
_PHASE_TAPS = {0: ((1, 0), (3, 1)), 1: ((0, -1), (2, 0))}

_ROLL_SIGN = None


def _roll_sign():
    """Direction of pltpu.roll: +1 if roll(x, s)[i] == x[i - s] (jnp.roll).

    Probed once with a tiny pallas_call.  Must first be called OUTSIDE any jit
    trace (prepare_params does this); later in-trace calls hit the cache.
    """
    global _ROLL_SIGN
    if _ROLL_SIGN is None:
        def k(x_ref, o_ref):
            o_ref[...] = pltpu.roll(x_ref[...], 1, axis=1)
        x = jnp.tile(jnp.arange(128, dtype=jnp.float32)[None, :], (8, 1))
        y = pl.pallas_call(
            k, out_shape=jax.ShapeDtypeStruct((8, 128), jnp.float32))(x)
        _ROLL_SIGN = 1 if int(y[0, 1]) == 0 else -1
    return _ROLL_SIGN


def _round_up(x, m):
    return ((x + m - 1) // m) * m


# --------------------------- in-kernel helpers ------------------------------ #

def _shifted(v, k, n, sign):
    """out[:, i] = v[:, i - k] (cyclic) via an XLU lane rotation."""
    amt = (k * sign) % n
    return pltpu.roll(v, amt, axis=1) if amt else v


def _build_patch(act, patch_ref, W, cm, rm, sign):
    """Write the 9 zero-padded spatial shifts of act (C, S) into patch rows.

    Returns the (9*C, S) MXU operand view living in the persistent VMEM
    scratch (no dict of temporaries, no concatenate copy).
    """
    c, s = act.shape
    for t, (dy, dx) in enumerate(_OFFSETS_3x3):
        v = act
        if dx:
            v = _shifted(v, dx, s, sign) * cm[dx]
        if dy:
            v = _shifted(v, dy * W, s, sign) * rm[dy]
        patch_ref[t * c:(t + 1) * c, :] = v
    return patch_ref[0:9 * c, :]


# ------------------------------ Pallas kernels ------------------------------ #

def _stem_res_ct2_kernel(mask_ref, x_ref, wct1_ref, bct1_ref, w3s_ref, w1s_ref,
                         wct2_ref, bct2_ref, o_ref, patch_ref,
                         *, n_res, W, sign):
    """Fused ConvT(3x3,s1,p1) + ResidualStack(+ReLU) + ConvT(4x4,s2,p1) + ReLU."""
    m = mask_ref[...]                                    # (4, S) bf16 edge masks
    cm = {1: m[0:1, :], -1: m[1:2, :]}                   # column-wrap masks
    rm = {1: m[2:3, :], -1: m[3:4, :]}                   # image top/bottom masks

    def conv3x3(act, w):                                 # act (Cin, S) bf16
        patch = _build_patch(act, patch_ref, W, cm, rm, sign)
        return jnp.dot(w, patch, preferred_element_type=jnp.float32)

    x = x_ref[0]                                         # (Cin_pad, S) bf16

    # ConvTranspose2d(in_dim, h_dim, 3, stride=1, padding=1)
    y = conv3x3(x, wct1_ref[...]) + bct1_ref[...]        # (h_dim, S) f32

    # ResidualStack: n_res x [ReLU -> 3x3 (no bias) -> ReLU -> 1x1 (no bias)] + x
    for l in range(n_res):
        h = jnp.maximum(y, 0.0).astype(jnp.bfloat16)
        h = conv3x3(h, w3s_ref[l])                       # (res_h, S) f32
        h = jnp.maximum(h, 0.0).astype(jnp.bfloat16)
        y = y + jnp.dot(w1s_ref[l], h, preferred_element_type=jnp.float32)
    y = jnp.maximum(y, 0.0).astype(jnp.bfloat16)         # stack's final ReLU

    # ConvTranspose2d(h_dim, h_dim//2, 4, 2, 1) + ReLU: all 4 sub-pixel phases
    # in one matmul; output rows grouped (py, px, cout_pad); single bias add.
    patch = _build_patch(y, patch_ref, W, cm, rm, sign)
    z = jnp.dot(wct2_ref[...], patch, preferred_element_type=jnp.float32)
    o_ref[0] = jnp.maximum(z + bct2_ref[...], 0.0).astype(o_ref.dtype)


def _deconv4x4_s2_kernel(cmask_ref, x_ref, w_ref, b_ref, o_ref, patch_ref,
                         *, W, blk_lanes, slab_lanes, sign, relu):
    """Phase-packed ConvTranspose2d(4x4, s=2, p=1) on one spatial row-block.

    x_ref holds the whole row-zero-padded flat image (resident across the
    spatial grid axis); each step slices a (Cin, slab) slab, builds the
    9-shift patch for the interior only, and does ONE matmul + ONE lane-dense
    store of all four phases.
    """
    cin = x_ref.shape[1]
    start = pl.program_id(1) * blk_lanes
    if blk_lanes % 128 == 0:
        start = pl.multiple_of(start, 128)
    slab = x_ref[0, :, pl.ds(start, slab_lanes)]         # (Cin, slab) bf16
    cm = {1: cmask_ref[0:1, :], -1: cmask_ref[1:2, :]}
    for t, (dy, dx) in enumerate(_OFFSETS_3x3):
        v = slab
        if dx:
            v = _shifted(v, dx, slab_lanes, sign) * cm[dx]
        # fold the 1-row halo offset into the row roll so the final slice is a
        # lane-aligned prefix (image top/bottom zeros come from the host pad)
        v = _shifted(v, (dy - 1) * W, slab_lanes, sign)
        patch_ref[t * cin:(t + 1) * cin, :] = v[:, 0:blk_lanes]
    z = jnp.dot(w_ref[...], patch_ref[...], preferred_element_type=jnp.float32)
    z = z + b_ref[...]
    if relu:
        z = jnp.maximum(z, 0.0)
    o_ref[0] = z.astype(o_ref.dtype)


# ------------------------------ host wrappers ------------------------------- #

def _edge_masks(H, W):
    """(4, H*W) bf16 masks [col!=0, col!=W-1, row!=0, row!=H-1]: kill both the
    conv's out-of-image taps and the cyclic wrap of pltpu.roll."""
    r = np.arange(H * W) // W
    c = np.arange(H * W) % W
    m = np.stack([c != 0, c != W - 1, r != 0, r != H - 1]).astype(np.float32)
    return jnp.asarray(m, jnp.bfloat16)


def _col_masks(length, W):
    c = np.arange(length) % W
    m = np.stack([c != 0, c != W - 1]).astype(np.float32)
    return jnp.asarray(m, jnp.bfloat16)


def _pick_row_block(Hr, Wr):
    """Row-block for the spatial grid axis: a proper divisor of Hr whose flat
    lane count is a multiple of 128 (lane-dense output blocks); whole image if
    no such divisor exists."""
    divs = [d for d in range(1, Hr) if Hr % d == 0 and (d * Wr) % 128 == 0]
    for lane_floor in (256, 128):
        for d in divs:
            if d * Wr >= lane_floor:
                return d
    return Hr


def _compiler_params(sem, tile_bytes):
    """Explicit scoped-VMEM budget (v7x: 64 MiB physical vs 128 on v5e/v6e)."""
    limit = int(min(48 * 2 ** 20, max(16 * 2 ** 20, 4 * int(tile_bytes))))
    return pltpu.CompilerParams(dimension_semantics=sem, vmem_limit_bytes=limit)


def stem_res_ct2(x_flat, prep, H, W):
    """Fused ConvT(3,1,1) + ResidualStack + ConvT(4,2,1) + ReLU.

    x_flat: (N, Cin_pad, H*W) bf16 -> phase-major (N, 4*cout2_pad, H*W) bf16.
    """
    N, cin_pad, S = x_flat.shape
    h_dim = prep["ct1_w"].shape[0]
    n_res = prep["res_w3"].shape[0]
    rows_out = prep["ct2_w"].shape[0]                    # 4 * cout2_pad
    masks = _edge_masks(H, W)
    patch_rows = 9 * max(cin_pad, h_dim)

    kernel = functools.partial(_stem_res_ct2_kernel, n_res=n_res, W=W,
                               sign=_roll_sign())
    weight_bytes = 2 * sum(int(np.prod(prep[k].shape))
                           for k in ("ct1_w", "res_w3", "res_w1", "ct2_w"))
    tile_bytes = (2 * (cin_pad + rows_out) * S * 2       # in/out blocks (dbl-buf)
                  + patch_rows * S * 2                   # patch scratch
                  + (h_dim + rows_out) * S * 4           # f32 accumulators
                  + weight_bytes + masks.size * 2)

    return pl.pallas_call(
        kernel,
        out_shape=jax.ShapeDtypeStruct((N, rows_out, S), jnp.bfloat16),
        grid=(N,),
        in_specs=[pl.BlockSpec((4, S), lambda n: (0, 0)),
                  pl.BlockSpec((1, cin_pad, S), lambda n: (n, 0, 0)),
                  pl.BlockSpec(prep["ct1_w"].shape, lambda n: (0, 0)),
                  pl.BlockSpec(prep["ct1_b"].shape, lambda n: (0, 0)),
                  pl.BlockSpec(prep["res_w3"].shape, lambda n: (0, 0, 0)),
                  pl.BlockSpec(prep["res_w1"].shape, lambda n: (0, 0, 0)),
                  pl.BlockSpec(prep["ct2_w"].shape, lambda n: (0, 0)),
                  pl.BlockSpec(prep["ct2_b"].shape, lambda n: (0, 0))],
        out_specs=pl.BlockSpec((1, rows_out, S), lambda n: (n, 0, 0)),
        scratch_shapes=[pltpu.VMEM((patch_rows, S), jnp.bfloat16)],
        compiler_params=_compiler_params(("parallel",), tile_bytes),
    )(masks, x_flat, prep["ct1_w"], prep["ct1_b"], prep["res_w3"],
      prep["res_w1"], prep["ct2_w"], prep["ct2_b"])


def deconv4x4_s2(x, w_packed, b_packed, *, relu, out_dtype):
    """ConvTranspose2d(k=4, s=2, p=1): (N, Cin, Hi, Wi) -> phase-major
    (N, 4*Cout_pad, Hi*Wi).  Spatially tiled with a 1-row zero halo."""
    N, cin, Hi, Wi = x.shape
    rows_out = w_packed.shape[0]

    blk_rows = _pick_row_block(Hi, Wi)
    blk_lanes = blk_rows * Wi
    nblk = Hi // blk_rows
    # 1 zero halo row on top; enough zero rows at the bottom so the slab stays
    # a multiple of 128 lanes (aligned rolls / prefix slices).
    bot = 1
    while (blk_lanes + (1 + bot) * Wi) % 128 != 0 and bot < 1 + 128:
        bot += 1
    slab_lanes = blk_lanes + (1 + bot) * Wi
    s_pad = (Hi + 1 + bot) * Wi

    xp = jnp.pad(x, ((0, 0), (0, 0), (1, bot), (0, 0))).reshape(N, cin, s_pad)
    cmask = _col_masks(slab_lanes, Wi)

    kernel = functools.partial(_deconv4x4_s2_kernel, W=Wi, blk_lanes=blk_lanes,
                               slab_lanes=slab_lanes, sign=_roll_sign(),
                               relu=relu)
    out_isz = np.dtype(out_dtype).itemsize
    tile_bytes = (2 * cin * s_pad * 2 + 2 * rows_out * blk_lanes * out_isz
                  + 9 * cin * blk_lanes * 2 + 2 * int(w_packed.size)
                  + 4 * int(b_packed.size) + 2 * int(cmask.size))

    return pl.pallas_call(
        kernel,
        out_shape=jax.ShapeDtypeStruct((N, rows_out, Hi * Wi), out_dtype),
        grid=(N, nblk),
        in_specs=[pl.BlockSpec((2, slab_lanes), lambda n, s: (0, 0)),
                  pl.BlockSpec((1, cin, s_pad), lambda n, s: (n, 0, 0)),
                  pl.BlockSpec(w_packed.shape, lambda n, s: (0, 0)),
                  pl.BlockSpec(b_packed.shape, lambda n, s: (0, 0))],
        out_specs=pl.BlockSpec((1, rows_out, blk_lanes), lambda n, s: (n, 0, s)),
        scratch_shapes=[pltpu.VMEM((9 * cin, blk_lanes), jnp.bfloat16)],
        compiler_params=_compiler_params(("parallel", "parallel"), tile_bytes),
    )(cmask, xp, w_packed, b_packed)


def decoder_forward(prep, x_nchw, *, out_dim):
    N, cin, H, W = x_nchw.shape
    cin_pad = prep["ct1_w"].shape[1] // 9
    h_dim = prep["ct1_w"].shape[0]
    h2 = h_dim // 2

    x = x_nchw.astype(jnp.bfloat16).reshape(N, cin, H * W)
    if cin_pad > cin:      # zero channel pad -> packed-K MXU path everywhere
        x = jnp.pad(x, ((0, 0), (0, cin_pad - cin), (0, 0)))

    # kernel 1: ConvT(3,1,1) + ResidualStack + ReLU + ConvT(4,2,1) + ReLU
    ph2 = stem_res_ct2(x, prep, H, W)                      # (N, 4*c2p, H*W)
    c2p = ph2.shape[1] // 4
    y = ph2.reshape(N, 2, 2, c2p, H, W).transpose(0, 3, 4, 1, 5, 2)
    y = y.reshape(N, c2p, 2 * H, 2 * W)[:, :h2]            # phase interleave
    # TODO(synk): make kernel 2 consume this phase-major layout directly
    # (phase-aware shifts) and drop this XLA interleave transpose.

    # kernel 2: ConvT(4,2,1) final layer (no ReLU), spatial grid axis
    ph3 = deconv4x4_s2(y, prep["ct3_w"], prep["ct3_b"],
                       relu=False, out_dtype=jnp.float32)  # (N, 4*c3p, 4*H*W)
    c3p = ph3.shape[1] // 4
    z = ph3.reshape(N, 2, 2, c3p, 2 * H, 2 * W).transpose(0, 3, 4, 1, 5, 2)
    z = z.reshape(N, c3p, 4 * H, 4 * W)[:, :out_dim]
    return z


# --------------------------- parameter handling ----------------------------- #

def prepare_params(p):
    """One-time repack of PyTorch-layout weights into kernel layouts (bf16)."""
    in_dim, h_dim = p["ct1_w"].shape[0], p["ct1_w"].shape[1]
    h2, out_dim = p["ct2_w"].shape[1], p["ct3_w"].shape[1]
    cin_pad = _round_up(max(in_dim, 16), 16)

    def pack_convT3(w, cpad):        # (Cin, Cout, 3, 3) -> (Cout, 9*cpad)
        cin, cout = w.shape[0], w.shape[1]
        wq = np.asarray(w, np.float32)
        out = np.zeros((cout, 9 * cpad), np.float32)
        for t, (dy, dx) in enumerate(_OFFSETS_3x3):
            out[:, t * cpad:t * cpad + cin] = wq[:, :, dy + 1, dx + 1].T
        return jnp.asarray(out, jnp.bfloat16)

    def pack_conv3(w):               # (Cout, Cin, 3, 3) -> (Cout, 9*Cin)
        wq = np.asarray(w, np.float32)
        blocks = [wq[:, :, 1 - dy, 1 - dx] for (dy, dx) in _OFFSETS_3x3]
        return jnp.asarray(np.concatenate(blocks, axis=1), jnp.bfloat16)

    def pack_convT4(w, b, cout_pad):  # -> (4*cout_pad, 9*Cin), (4*cout_pad, 1)
        cin, cout = w.shape[0], w.shape[1]
        wq, bq = np.asarray(w, np.float32), np.asarray(b, np.float32)
        wp = np.zeros((4 * cout_pad, 9 * cin), np.float32)
        bp = np.zeros((4 * cout_pad, 1), np.float32)
        for py in (0, 1):
            kys = {d: k for (k, d) in _PHASE_TAPS[py]}
            for px in (0, 1):
                kxs = {d: k for (k, d) in _PHASE_TAPS[px]}
                r0 = (py * 2 + px) * cout_pad
                bp[r0:r0 + cout, 0] = bq
                for t, (dy, dx) in enumerate(_OFFSETS_3x3):
                    if dy in kys and dx in kxs:
                        wp[r0:r0 + cout, t * cin:(t + 1) * cin] = \
                            wq[:, :, kys[dy], kxs[dx]].T
        return jnp.asarray(wp, jnp.bfloat16), jnp.asarray(bp, jnp.float32)

    prep = {
        "ct1_w": pack_convT3(p["ct1_w"], cin_pad),
        "ct1_b": jnp.asarray(np.asarray(p["ct1_b"], np.float32).reshape(-1, 1)),
        "res_w3": jnp.stack([pack_conv3(w3) for (w3, _) in p["res"]]),
        "res_w1": jnp.stack(
            [jnp.asarray(np.asarray(w1, np.float32)[:, :, 0, 0], jnp.bfloat16)
             for (_, w1) in p["res"]]),
    }
    prep["ct2_w"], prep["ct2_b"] = pack_convT4(p["ct2_w"], p["ct2_b"],
                                               _round_up(h2, 16))
    prep["ct3_w"], prep["ct3_b"] = pack_convT4(p["ct3_w"], p["ct3_b"],
                                               _round_up(out_dim, 8))
    _roll_sign()   # probe pltpu.roll's direction now, outside any jit trace
    return prep


def init_params(key, in_dim, h_dim, out_dim, res_h_dim, n_res):
    keys = iter(jax.random.split(key, 6 + 2 * n_res))

    def u(k, shape, fan_in):
        s = 1.0 / np.sqrt(fan_in)
        return jax.random.uniform(k, shape, jnp.float32, -s, s)

    p = {}
    p["ct1_w"] = u(next(keys), (in_dim, h_dim, 3, 3), in_dim * 9)
    p["ct1_b"] = u(next(keys), (h_dim,), in_dim * 9)
    res = []
    for _ in range(n_res):
        w3 = u(next(keys), (res_h_dim, h_dim, 3, 3), h_dim * 9)
        w1 = u(next(keys), (h_dim, res_h_dim, 1, 1), res_h_dim)
        res.append((w3, w1))
    p["res"] = res
    h2 = h_dim // 2
    p["ct2_w"] = u(next(keys), (h_dim, h2, 4, 4), h_dim * 16)
    p["ct2_b"] = u(next(keys), (h2,), h_dim * 16)
    p["ct3_w"] = u(next(keys), (h2, out_dim, 4, 4), h2 * 16)
    p["ct3_b"] = u(next(keys), (out_dim,), h2 * 16)
    return p


# --------------------------- pure-JAX reference ----------------------------- #

def _ref_decoder(params, x):
    def convT(x, w, b, stride, padding):
        kh, kw = w.shape[2], w.shape[3]
        wf = jnp.transpose(jnp.flip(w, (2, 3)), (1, 0, 2, 3))
        pad = [(kh - 1 - padding,) * 2, (kw - 1 - padding,) * 2]
        y = jax.lax.conv_general_dilated(
            x, wf, (1, 1), pad, lhs_dilation=(stride, stride),
            dimension_numbers=("NCHW", "OIHW", "NCHW"))
        return y + b[None, :, None, None]

    def conv(x, w, padding):
        return jax.lax.conv_general_dilated(
            x, w, (1, 1), [(padding, padding)] * 2,
            dimension_numbers=("NCHW", "OIHW", "NCHW"))

    y = convT(x, params["ct1_w"], params["ct1_b"], 1, 1)
    for (w3, w1) in params["res"]:
        h = conv(jax.nn.relu(y), w3, 1)
        h = conv(jax.nn.relu(h), w1, 0)
        y = y + h
    y = jax.nn.relu(y)
    y = jax.nn.relu(convT(y, params["ct2_w"], params["ct2_b"], 2, 1))
    y = convT(y, params["ct3_w"], params["ct3_b"], 2, 1)
    return y


# ----------------------------------- main ----------------------------------- #

if __name__ == "__main__":
    key = jax.random.PRNGKey(0)
    kp, kx = jax.random.split(key)

    N, in_dim, h_dim, out_dim, res_h_dim, n_res = 2, 4, 32, 3, 16, 2
    H = W = 16   # decoder upsamples 4x -> output spatial 64x64

    params = init_params(kp, in_dim, h_dim, out_dim, res_h_dim, n_res)
    x = jax.random.normal(kx, (N, in_dim, H, W), jnp.float32)   # NCHW

    prep = prepare_params(params)        # one-time weight repack + roll probe
    fwd = jax.jit(functools.partial(decoder_forward, out_dim=out_dim))
    y = jax.block_until_ready(fwd(prep, x))

    assert y.shape == (N, out_dim, 4 * H, 4 * W), y.shape
    assert bool(jnp.all(jnp.isfinite(y)))

    # numerical check against a pure-JAX (lax.conv) reference
    y_ref = jax.block_until_ready(jax.jit(_ref_decoder)(params, x))
    rel = float(jnp.linalg.norm(y - y_ref) / (jnp.linalg.norm(y_ref) + 1e-12))
    assert rel < 5e-2, f"relative error too high: {rel}"

    print("KERNEL_OK")
</pallas_src>

<mosaic_0001>
module attributes {stable_mosaic.version = 11 : i64} {
  func.func @k(%arg0: memref<8x128xf32, #tpu.memory_space<vmem>>, %arg1: memref<8x128xf32, #tpu.memory_space<vmem>>) attributes {dimension_semantics = [], scalar_prefetch = 0 : i64, scratch_operands = 0 : i64, tpu.core_type = #tpu.core_type<tc>} {
    %c0 = arith.constant 0 : index
    %c0_0 = arith.constant 0 : index
    %0 = vector.load %arg0[%c0, %c0_0] : memref<8x128xf32, #tpu.memory_space<vmem>>, vector<8x128xf32>
    %c1_i32 = arith.constant 1 : i32
    %1 = tpu.dynamic_rotate %0 by %c1_i32 dim 1 : vector<8x128xf32>, i32 -> vector<8x128xf32>
    %c0_1 = arith.constant 0 : index
    %c0_2 = arith.constant 0 : index
    %2 = vector.load %arg1[%c0_1, %c0_2] : memref<8x128xf32, #tpu.memory_space<vmem>>, vector<8x128xf32>
    tpu.vector_store %arg1[%c0_1, %c0_2], %1 {strides = array<i32>} : memref<8x128xf32, #tpu.memory_space<vmem>>, vector<8x128xf32>,
    return
  }
}

</mosaic_0001>

<bundles_post_ra>
// kernel: tpu_custom_call.1
= control target key start
LH: loop header
LB: loop body
LE: loop exit
PB: predicated region body
PF: predicated region fallthrough
CT: control target
= control target key end

     0   :  { %6 = vsyncpa [#allocation3], 0  ;;  %s118_s0 = inlined_call_operand.hbm [shape: f32[8,128], index: 0, kind: input, shape index: {}]   ;;  %s119_s1 = inlined_call_operand.hbm [shape: f32[8,128], index: 1, kind: output, shape index: {}]  }
   0x1   :  { %7 = vsyncpa [#allocation4], 0  ;;  %s13_s8 = sshll.u32 %s118_s0, 4  ;;  %s99_s9 = smov [#allocation2]   ;;  %s14_s8 = int_to_ptr.hbm [resolvable:$true] %s13_s8 }
   0x2   :  { %s15_s10 = sshll.u32 %s99_s9, 4  ;;  %s16_s10 = int_to_ptr.vmem [resolvable:$true] %s15_s10 }
   0x3   :  { %18 = dma.hbm_to_vmem [thread:$0]  %s14_s8, 128, %s16_s10, [#allocation3]  }
   0x4   :  { %95 = dma.done.wait [#allocation3], 128  }
   0x5   :  { %96 = vsyncadd [#allocation3], 4294967168  ;;  %v23_v0 = vld [vmem:[#allocation2] sm:$0xff]  ;;  %s100_s11 = smov 1   ;;  %s101_s12 = smov [#allocation5]  }
   0x6   :  { %24 = vrot.lane.b32.xlu0 %v23_v0, %s100_s11  ;;  %s32_s13 = sshll.u32 %s101_s12, 4  ;;  %s34_s16 = sshll.u32 %s119_s1, 4  ;;  %s33_s13 = int_to_ptr.vmem [resolvable:$true] %s32_s13  ;;  %s35_s16 = int_to_ptr.hbm [resolvable:$true] %s34_s16 }
  0x78   :  { %v25_v1 = vpop.permute.xlu0 %24 }
  0x79   :  { %26 = vst [vmem:[#allocation5] sm:$0xff] %v25_v1 }
  0x7a   :  { %37 = dma.vmem_to_hbm [thread:$0]  %s33_s13, 128, %s35_s16, [#allocation4]  }
  0x7b   :  { %97 = dma.done.wait [#allocation4], 128  }
  0x7c   :  { %98 = vsyncadd [#allocation4], 4294967168 }
  0x7d   :  { %42 = vsyncpa [#allocation3], 1 }
  0x7e   :  { %43 = vsyncpa [#allocation4], 1 }

</bundles_post_ra>
